<compile_context>
chip_gen: v7x
topology: tpu7x:2x2x1
jax: 0.10.0
libtpu: 0.0.40
codegen_flags: <defaults>
</compile_context>

<pallas_src>
import functools

import jax
import jax.numpy as jnp
from jax import lax
from jax.experimental import pallas as pl
from jax.experimental.pallas import tpu as pltpu


def _round_up(x, m):
    return (x + m - 1) // m * m


def _vmem_capacity_bytes():
    """Generation-aware VMEM capacity; conservative fallback if unqueryable."""
    try:
        info = pltpu.get_tpu_info()
        cap = getattr(info, "vmem_capacity_bytes", None)
        if cap:
            return int(cap)
    except Exception:
        pass
    return 64 << 20  # v7x per-TC VMEM (safe lower bound everywhere)


def _channel_attention_kernel(x_ref, w1_ref, w2_ref, o_ref,
                              sum_acc, max_acc, *, hw_total, hw_tile, nk):
    # x_ref:   (1, bt, C, hw_tile)  streamed input tile (stream dtype)
    # w1_ref:  (C, Cr)              conv1 weight, transposed (VMEM-resident)
    # w2_ref:  (Cr, C)              conv2 weight, transposed (VMEM-resident)
    # o_ref:   (1, bt, C)           sigmoid(attention logits)
    # sum_acc: (bt, C) f32          running spatial sum
    # max_acc: (bt, C) f32          running spatial max
    k = pl.program_id(1)

    @pl.when(k == 0)
    def _init():
        sum_acc[...] = jnp.zeros_like(sum_acc)
        max_acc[...] = jnp.full_like(max_acc, -jnp.inf)

    x = x_ref[0]                                    # (bt, C, hw_tile)

    # Sum path: wrapper zero-pads, so padded columns contribute 0 -> no mask.
    sum_acc[...] = sum_acc[...] + jnp.sum(x.astype(jnp.float32), axis=-1)

    def _plain_max():
        max_acc[...] = jnp.maximum(
            max_acc[...], jnp.max(x, axis=-1).astype(jnp.float32))

    def _masked_max():
        # Static remainder mask (-inf) so zero-padding cannot corrupt the max.
        start = (nk - 1) * hw_tile
        col = start + lax.broadcasted_iota(jnp.int32, x.shape, 2)
        xm = jnp.where(col < hw_total, x, -jnp.inf)
        max_acc[...] = jnp.maximum(
            max_acc[...], jnp.max(xm, axis=-1).astype(jnp.float32))

    if hw_total % hw_tile != 0:
        # Mask only on the remainder tile; steady-state stays load+add+max.
        if nk > 1:
            pl.when(k != nk - 1)(_plain_max)
        pl.when(k == nk - 1)(_masked_max)
    else:
        _plain_max()

    @pl.when(k == nk - 1)
    def _finalize():
        bt = sum_acc.shape[0]
        avg = sum_acc[...] * (1.0 / hw_total)        # true-HW mean
        mx = max_acc[...]

        # Fused shared MLP over stacked (avg, max): dot -> ReLU -> dot.
        p = jnp.concatenate([avg, mx], axis=0)       # (2*bt, C)
        h = jnp.maximum(
            jnp.dot(p, w1_ref[...], preferred_element_type=jnp.float32), 0.0)
        y = jnp.dot(h, w2_ref[...], preferred_element_type=jnp.float32)

        o_ref[0] = jax.nn.sigmoid(y[:bt] + y[bt:]).astype(o_ref.dtype)


def channel_attention(x, w1_conv, w2_conv, *, hw_tile=None, stream_dtype="auto"):
    """x: (B, C, H, W) NCHW.
    w1_conv: (Cr, C)  == squeezed Conv2d(C, Cr, 1, bias=False).weight
    w2_conv: (C, Cr)  == squeezed Conv2d(Cr, C, 1, bias=False).weight
    Returns (B, C, 1, 1) attention map, matching the PyTorch module."""
    B, C, H, W = x.shape
    HW = H * W
    Cr = w1_conv.shape[0]
    out_dtype = x.dtype

    if stream_dtype == "auto":
        # bf16 streaming halves HBM bytes on this read-bound kernel; sums still
        # accumulate in f32, max is exact on the bf16-cast values.
        stream_dtype = jnp.bfloat16 if x.dtype == jnp.float32 else x.dtype
    stream_dtype = jnp.dtype(stream_dtype)
    itemsize = stream_dtype.itemsize

    # Batch tiling: keep bt small enough that nb >= 2 (v7x megacore gets a
    # shardable "parallel" axis even for B=2); output layout (nb, bt, C) keeps
    # all block dims full-extent, so any bt is layout-legal.
    if B == 1:
        bt = 1
    else:
        cap = min(8, B // 2)
        bt = max(d for d in range(1, cap + 1) if B % d == 0)
    nb = B // bt

    # Generation-aware VMEM budget.
    vmem_cap = _vmem_capacity_bytes()
    big_vmem = vmem_cap >= (100 << 20)                # v5e/v6e: 128 MiB; v7x: 64 MiB
    x_buf_budget = (24 << 20) if big_vmem else (10 << 20)   # per pipeline buffer

    # HW tile: whole HW per block when it fits (nk == 1, single pass), else the
    # biggest 128-lane multiple within the per-buffer budget.
    if hw_tile is None:
        hw_full = _round_up(HW, 128)
        if bt * C * hw_full * itemsize <= x_buf_budget:
            hw_tile = hw_full
        else:
            lanes = (x_buf_budget // (bt * C * itemsize)) // 128 * 128
            hw_tile = max(128, int(lanes))
    assert hw_tile % 128 == 0

    hw_pad = _round_up(HW, hw_tile)
    nk = hw_pad // hw_tile

    x2 = x.reshape(B, C, HW).astype(stream_dtype)
    if hw_pad != HW:
        x2 = jnp.pad(x2, ((0, 0), (0, 0), (0, hw_pad - HW)))   # zero pad
    x2 = x2.reshape(nb, bt, C, hw_pad)

    w1 = w1_conv.T.astype(jnp.float32)          # (C, Cr):  pooled @ w1 == conv1
    w2 = w2_conv.T.astype(jnp.float32)          # (Cr, C):  hidden @ w2 == conv2

    kernel = functools.partial(
        _channel_attention_kernel, hw_total=HW, hw_tile=hw_tile, nk=nk)

    # Advisory cost: essentially a full read of x (HBM-bound).
    cost = pl.CostEstimate(
        flops=int(2 * B * C * HW + 2 * 2 * (2 * B) * C * Cr),
        transcendentals=int(B * C),
        bytes_accessed=int(x2.size * itemsize + (w1.size + w2.size) * 4
                           + B * C * jnp.dtype(out_dtype).itemsize),
    )

    needed = (2 * bt * C * hw_tile * itemsize          # x double-buffer
              + 2 * (w1.size + w2.size) * 4            # resident weights
              + 2 * bt * C * jnp.dtype(out_dtype).itemsize
              + 2 * bt * C * 4)                        # scratch accumulators
    vmem_upper = (100 << 20) if big_vmem else (48 << 20)
    vmem_limit = int(min(max(needed + (4 << 20), 32 << 20), vmem_upper))

    out = pl.pallas_call(
        kernel,
        out_shape=jax.ShapeDtypeStruct((nb, bt, C), out_dtype),
        grid=(nb, nk),
        in_specs=[
            pl.BlockSpec((1, bt, C, hw_tile), lambda b, k: (b, 0, 0, k)),
            pl.BlockSpec((C, Cr), lambda b, k: (0, 0)),   # resident weights
            pl.BlockSpec((Cr, C), lambda b, k: (0, 0)),   # resident weights
        ],
        out_specs=pl.BlockSpec((1, bt, C), lambda b, k: (b, 0, 0)),
        scratch_shapes=[
            pltpu.VMEM((bt, C), jnp.float32),             # running sum
            pltpu.VMEM((bt, C), jnp.float32),             # running max
        ],
        compiler_params=pltpu.CompilerParams(
            dimension_semantics=("parallel", "arbitrary"),
            vmem_limit_bytes=vmem_limit,
        ),
        cost_estimate=cost,
    )(x2, w1, w2)

    return out.reshape(B, C, 1, 1)


def channel_attention_ref(x, w1_conv, w2_conv):
    """Pure-JAX reference mirroring the PyTorch module."""
    avg = jnp.mean(x, axis=(2, 3))               # (B, C)
    mx = jnp.max(x, axis=(2, 3))                 # (B, C)

    def fc(p):
        h = jnp.maximum(p @ w1_conv.T, 0.0)      # (B, Cr)
        return h @ w2_conv.T                     # (B, C)

    out = jax.nn.sigmoid(fc(avg) + fc(mx))
    return out[:, :, None, None]


if __name__ == "__main__":
    B, C = 2, 64
    reduction_ratio = 16
    Cr = C // reduction_ratio                    # 4

    key = jax.random.PRNGKey(0)
    kx, k1, k2, kx2 = jax.random.split(key, 4)

    # Conv2d(C, Cr, 1, bias=False).weight squeezed -> (Cr, C)
    w1_conv = jax.random.normal(k1, (Cr, C), dtype=jnp.float32) * 0.1
    # Conv2d(Cr, C, 1, bias=False).weight squeezed -> (C, Cr)
    w2_conv = jax.random.normal(k2, (C, Cr), dtype=jnp.float32) * 0.1

    x = jax.random.normal(kx, (B, C, 16, 16), dtype=jnp.float32)
    ref_f32 = channel_attention_ref(x, w1_conv, w2_conv)

    # Case A: default path (bf16 streaming, full-HW single-pass tile, nb=2).
    out = jax.block_until_ready(channel_attention(x, w1_conv, w2_conv))
    assert out.shape == (B, C, 1, 1)
    ref_bf16 = channel_attention_ref(
        x.astype(jnp.bfloat16).astype(jnp.float32), w1_conv, w2_conv)
    assert jnp.allclose(out, ref_bf16, rtol=1e-3, atol=1e-3)
    assert jnp.allclose(out, ref_f32, rtol=5e-2, atol=5e-2)

    # Case B: f32 streaming, forced multi-step reduction (nk=2) -> exact.
    out_b = jax.block_until_ready(channel_attention(
        x, w1_conv, w2_conv, hw_tile=128, stream_dtype=jnp.float32))
    assert jnp.allclose(out_b, ref_f32, rtol=1e-5, atol=1e-5)

    # Case C: HW not a multiple of the tile -> remainder -inf masking (nk=2).
    x_odd = jax.random.normal(kx2, (B, C, 12, 12), dtype=jnp.float32)
    out_c = jax.block_until_ready(channel_attention(
        x_odd, w1_conv, w2_conv, hw_tile=128, stream_dtype=jnp.float32))
    ref_c = channel_attention_ref(x_odd, w1_conv, w2_conv)
    assert out_c.shape == (B, C, 1, 1)
    assert jnp.allclose(out_c, ref_c, rtol=1e-5, atol=1e-5)

    print("KERNEL_OK")
</pallas_src>

<mosaic_0001>
module attributes {stable_mosaic.version = 11 : i64} {
  func.func @_channel_attention_kernel(%arg0: i32, %arg1: i32, %arg2: memref<1x1x64x256xbf16, #tpu.memory_space<vmem>>, %arg3: memref<64x4xf32, #tpu.memory_space<vmem>>, %arg4: memref<4x64xf32, #tpu.memory_space<vmem>>, %arg5: memref<1x1x64xf32, #tpu.memory_space<vmem>>, %arg6: memref<1x64xf32, #tpu.memory_space<vmem>>, %arg7: memref<1x64xf32, #tpu.memory_space<vmem>>) attributes {dimension_semantics = [#tpu.dimension_semantics<parallel>, #tpu.dimension_semantics<arbitrary>], iteration_bounds = array<i64: 2, 1>, scalar_prefetch = 0 : i64, scratch_operands = 2 : i64, tpu.core_type = #tpu.core_type<tc>, window_params = [{transform_indices = @transform_0, window_bounds = array<i64: 1, 1, 64, 256>}, {pipeline_mode = #tpu.pipeline_mode<synchronous>, transform_indices = @transform_1, window_bounds = array<i64: 64, 4>}, {pipeline_mode = #tpu.pipeline_mode<synchronous>, transform_indices = @transform_2, window_bounds = array<i64: 4, 64>}, {transform_indices = @transform_3, window_bounds = array<i64: 1, 1, 64>}]} {
    %c0_i32 = arith.constant 0 : i32
    %0 = arith.cmpi eq, %arg1, %c0_i32 : i32
    %1 = arith.extui %0 : i1 to i32
    %c0_i32_0 = arith.constant 0 : i32
    %2 = arith.cmpi ne, %1, %c0_i32_0 : i32
    scf.if %2 {
      %cst_15 = arith.constant 0.000000e+00 : f32
      %18 = vector.broadcast %cst_15 : f32 to vector<1x64xf32>
      %c0_16 = arith.constant 0 : index
      %c0_17 = arith.constant 0 : index
      %19 = vector.load %arg6[%c0_16, %c0_17] : memref<1x64xf32, #tpu.memory_space<vmem>>, vector<1x64xf32>
      tpu.vector_store %arg6[%c0_16, %c0_17], %18 {strides = array<i32>} : memref<1x64xf32, #tpu.memory_space<vmem>>, vector<1x64xf32>,
      %cst_18 = arith.constant 0xFF800000 : f32
      %20 = vector.broadcast %cst_18 : f32 to vector<1x64xf32>
      %c0_19 = arith.constant 0 : index
      %c0_20 = arith.constant 0 : index
      %21 = vector.load %arg7[%c0_19, %c0_20] : memref<1x64xf32, #tpu.memory_space<vmem>>, vector<1x64xf32>
      tpu.vector_store %arg7[%c0_19, %c0_20], %20 {strides = array<i32>} : memref<1x64xf32, #tpu.memory_space<vmem>>, vector<1x64xf32>,
    } else {
    }
    %c0 = arith.constant 0 : index
    %c0_1 = arith.constant 0 : index
    %c0_2 = arith.constant 0 : index
    %c0_3 = arith.constant 0 : index
    %3 = vector.load %arg2[%c0, %c0_1, %c0_2, %c0_3] : memref<1x1x64x256xbf16, #tpu.memory_space<vmem>>, vector<1x1x64x256xbf16>
    %4 = vector.shape_cast %3 : vector<1x1x64x256xbf16> to vector<1x64x256xbf16>
    %c0_4 = arith.constant 0 : index
    %c0_5 = arith.constant 0 : index
    %5 = vector.load %arg6[%c0_4, %c0_5] : memref<1x64xf32, #tpu.memory_space<vmem>>, vector<1x64xf32>
    %6 = arith.extf %4 : vector<1x64x256xbf16> to vector<1x64x256xf32>
    %cst = arith.constant dense<0.000000e+00> : vector<1x64xf32>
    %7 = vector.multi_reduction <add>, %6, %cst [2] : vector<1x64x256xf32> to vector<1x64xf32>
    %8 = arith.addf %5, %7 : vector<1x64xf32>
    %c0_6 = arith.constant 0 : index
    %c0_7 = arith.constant 0 : index
    %9 = vector.load %arg6[%c0_6, %c0_7] : memref<1x64xf32, #tpu.memory_space<vmem>>, vector<1x64xf32>
    tpu.vector_store %arg6[%c0_6, %c0_7], %8 {strides = array<i32>} : memref<1x64xf32, #tpu.memory_space<vmem>>, vector<1x64xf32>,
    %c0_8 = arith.constant 0 : index
    %c0_9 = arith.constant 0 : index
    %10 = vector.load %arg7[%c0_8, %c0_9] : memref<1x64xf32, #tpu.memory_space<vmem>>, vector<1x64xf32>
    %cst_10 = arith.constant dense<0xFF80> : vector<1x64xbf16>
    %11 = vector.multi_reduction <maximumf>, %4, %cst_10 [2] : vector<1x64x256xbf16> to vector<1x64xbf16>
    %12 = arith.extf %11 : vector<1x64xbf16> to vector<1x64xf32>
    %13 = arith.maximumf %10, %12 : vector<1x64xf32>
    %c0_11 = arith.constant 0 : index
    %c0_12 = arith.constant 0 : index
    %14 = vector.load %arg7[%c0_11, %c0_12] : memref<1x64xf32, #tpu.memory_space<vmem>>, vector<1x64xf32>
    tpu.vector_store %arg7[%c0_11, %c0_12], %13 {strides = array<i32>} : memref<1x64xf32, #tpu.memory_space<vmem>>, vector<1x64xf32>,
    %c0_i32_13 = arith.constant 0 : i32
    %15 = arith.cmpi eq, %arg1, %c0_i32_13 : i32
    %16 = arith.extui %15 : i1 to i32
    %c0_i32_14 = arith.constant 0 : i32
    %17 = arith.cmpi ne, %16, %c0_i32_14 : i32
    scf.if %17 {
      %c0_15 = arith.constant 0 : index
      %c0_16 = arith.constant 0 : index
      %18 = vector.load %arg6[%c0_15, %c0_16] : memref<1x64xf32, #tpu.memory_space<vmem>>, vector<1x64xf32>
      %cst_17 = arith.constant 3.906250e-03 : f32
      %19 = vector.broadcast %cst_17 : f32 to vector<1x64xf32>
      %20 = arith.mulf %18, %19 : vector<1x64xf32>
      %c0_18 = arith.constant 0 : index
      %c0_19 = arith.constant 0 : index
      %21 = vector.load %arg7[%c0_18, %c0_19] : memref<1x64xf32, #tpu.memory_space<vmem>>, vector<1x64xf32>
      %22 = tpu.concatenate %20, %21 in 0 : vector<1x64xf32>, vector<1x64xf32> -> vector<2x64xf32>
      %c0_20 = arith.constant 0 : index
      %c0_21 = arith.constant 0 : index
      %23 = vector.load %arg3[%c0_20, %c0_21] : memref<64x4xf32, #tpu.memory_space<vmem>>, vector<64x4xf32>
      %cst_22 = arith.constant dense<0.000000e+00> : vector<2x4xf32>
      %24 = tpu.matmul %22, %23, %cst_22 {dimension_numbers = #tpu.dot_dimension_numbers<[1], [0], [0], [1], [0, 0, 1, 1], [], []>} : vector<2x64xf32>, vector<64x4xf32>, vector<2x4xf32> -> vector<2x4xf32>
      %cst_23 = arith.constant 0.000000e+00 : f32
      %25 = vector.broadcast %cst_23 : f32 to vector<2x4xf32>
      %26 = arith.maximumf %24, %25 : vector<2x4xf32>
      %c0_24 = arith.constant 0 : index
      %c0_25 = arith.constant 0 : index
      %27 = vector.load %arg4[%c0_24, %c0_25] : memref<4x64xf32, #tpu.memory_space<vmem>>, vector<4x64xf32>
      %cst_26 = arith.constant dense<0.000000e+00> : vector<2x64xf32>
      %28 = tpu.matmul %26, %27, %cst_26 {dimension_numbers = #tpu.dot_dimension_numbers<[1], [0], [0], [1], [0, 0, 1, 1], [], []>} : vector<2x4xf32>, vector<4x64xf32>, vector<2x64xf32> -> vector<2x64xf32>
      %29 = vector.extract_strided_slice %28 {offsets = [0, 0], sizes = [1, 64], strides = [1, 1]} : vector<2x64xf32> to vector<1x64xf32>
      %30 = vector.extract_strided_slice %28 {offsets = [1, 0], sizes = [1, 64], strides = [1, 1]} : vector<2x64xf32> to vector<1x64xf32>
      %31 = arith.addf %29, %30 : vector<1x64xf32>
      %32 = arith.negf %31 : vector<1x64xf32>
      %33 = math.exp %32 : vector<1x64xf32>
      %cst_27 = arith.constant 1.000000e+00 : f32
      %34 = vector.broadcast %cst_27 : f32 to vector<1x64xf32>
      %35 = arith.addf %34, %33 : vector<1x64xf32>
      %36 = arith.divf %34, %35 : vector<1x64xf32>
      %c0_28 = arith.constant 0 : index
      %c0_29 = arith.constant 0 : index
      %c0_30 = arith.constant 0 : index
      %37 = vector.load %arg5[%c0_28, %c0_29, %c0_30] : memref<1x1x64xf32, #tpu.memory_space<vmem>>, vector<1x1x64xf32>
      %38 = vector.shape_cast %37 : vector<1x1x64xf32> to vector<1x64xf32>
      %39 = vector.shape_cast %36 : vector<1x64xf32> to vector<1x1x64xf32>
      tpu.vector_store %arg5[%c0_28, %c0_29, %c0_30], %39 {strides = array<i32>} : memref<1x1x64xf32, #tpu.memory_space<vmem>>, vector<1x1x64xf32>,
    } else {
    }
    return
  }
  func.func @transform_0(%arg0: i32, %arg1: i32) -> (i32, i32, i32, i32) {
    %c0_i32 = arith.constant 0 : i32
    %c0_i32_0 = arith.constant 0 : i32
    %c0_i32_1 = arith.constant 0 : i32
    return %arg0, %c0_i32, %c0_i32_0, %arg1 : i32, i32, i32, i32
  }
  func.func @transform_1(%arg0: i32, %arg1: i32) -> (i32, i32) {
    %c0_i32 = arith.constant 0 : i32
    %c0_i32_0 = arith.constant 0 : i32
    %c0_i32_1 = arith.constant 0 : i32
    return %c0_i32, %c0_i32_0 : i32, i32
  }
  func.func @transform_2(%arg0: i32, %arg1: i32) -> (i32, i32) {
    %c0_i32 = arith.constant 0 : i32
    %c0_i32_0 = arith.constant 0 : i32
    %c0_i32_1 = arith.constant 0 : i32
    return %c0_i32, %c0_i32_0 : i32, i32
  }
  func.func @transform_3(%arg0: i32, %arg1: i32) -> (i32, i32, i32) {
    %c0_i32 = arith.constant 0 : i32
    %c0_i32_0 = arith.constant 0 : i32
    %c0_i32_1 = arith.constant 0 : i32
    return %arg0, %c0_i32, %c0_i32_0 : i32, i32, i32
  }
}

</mosaic_0001>

<bundles_post_ra>
// kernel: tpu_custom_call.1
= control target key start
LH: loop header
LB: loop body
LE: loop exit
PB: predicated region body
PF: predicated region fallthrough
CT: control target
= control target key end

     0   :  { %8 = vsyncpa [#allocation5], 0  ;;  %s2966_s0 = inlined_call_operand.hbm [shape: bf16[2,1,64,256], index: 0, kind: input, shape index: {}]   ;;  %s2967_s1 = inlined_call_operand.vmem [shape: f32[64,4], index: 1, kind: input, shape index: {}]   ;;  %s2968_s2 = inlined_call_operand.vmem [shape: f32[4,64], index: 2, kind: input, shape index: {}]   ;;  %s2969_s3 = inlined_call_operand.hbm [shape: f32[2,1,64], index: 3, kind: output, shape index: {}]  }
   0x1   :  { %10 = vsyncpa [#allocation5 + $0x1], 0 }
   0x2   :  { %11 = vsyncpa [#allocation6], 0 }
   0x3   :  { %13 = vsyncpa [#allocation6 + $0x1], 0  ;;  %s2389_s12 = smov 0   ;;  %s2391_s13 = smov 0  }
   0x4   :  { %s2393_s14 = smov 0   ;;  %s2395_s15 = smov 0  }
   0x5   :  { %s2397_s16 = smov 0   ;;  %s2399_s17 = smov 0  }
   0x6 LB: > { %s2088_s18 = sadd.s32 4294967295, %s2357_s17   ;;  %s2089_s19 = sadd.s32 4294967294, %s2357_s17   ;;  %s2357_s17 = sphi %s2399_s17, %s19_s17   ;;  %s2353_s16 = sphi %s2397_s16, %s2984_s16   ;;  %s2349_s15 = sphi %s2395_s15, %s2983_s15   ;;  %s2345_s14 = sphi %s2393_s14, %s2982_s14   ;;  %s2341_s13 = sphi %s2391_s13, %s2981_s13   ;;  %s2337_s12 = sphi %s2389_s12, %s2980_s12  }
   0x7   : > { %s31_s20 = sadd.s32 1, %s2353_s16  ;;  %s40_s21 = sadd.s32 1, %s2345_s14 }
   0x8   : > { %p33_p0 = scmp.ge.s32.totalorder %s31_s20, 2  ;;  %p47_p1 = scmp.ne.s32.totalorder %s2345_s14, %s2341_s13 }
   0x9   : > { %p48_p2 = scmp.eq.s32.totalorder %s2357_s17, 0  ;;  %p53_p3 = scmp.ne.s32.totalorder %s2341_s13, %s2337_s12 }
   0xa   : > { %s2986_s20 = smov (%p33_p0, %s31_s20), 0  ;;  %p54_p5 = scmp.eq.s32.totalorder %s2088_s18, 0 }
   0xb   : > { %p2430_p4 = por %p48_p2, %p47_p1  ;;  %s35_s23 = ssub.s32 %s2353_s16, %s2986_s20 }
   0xc   : > { %p119_p6 = scmp.eq.s32.totalorder %s2088_s18, 1  ;;  %p38_p7 = scmp.eq.s32.totalorder %s35_s23, 0 }
   0xd   : > { %p2436_p8 = por %p54_p5, %p53_p3  ;;  %p125_p10 = scmp.eq.s32.totalorder %s2089_s19, 1 }
   0xe   : > { %p2440_p9 = por %p119_p6, %p47_p1  ;;  %p2173_p13 = scmp.lt.s32.totalorder %s2357_s17, 2 }
   0xf   : > { %s2445_s26 = scalar_select %p38_p7, %s2345_s14, %s40_s21  }
  0x10   : > { %s2973_s25 = scalar_select %p2440_p9, 1, 0 }
  0x11   : > { %p2447_p11 = por %p125_p10, %p53_p3  ;;  %s151_s28 = sand.u32 1, %s2345_s14  }
  0x12   : > { %s2092_s29 = sshll.u32 %s151_s28, 6  ;;  %s2113_s30 = sshll.u32 %s2353_s16, 10 }
  0x13   : > { %s2974_s27 = scalar_select %p2447_p11, 1, 0 }
  0x14   : > { %s2458_s6 = scalar_lea.hbm %s2966_s0, %s2113_s30  ;;  %s155_s7 = scalar_lea.vmem [#allocation4], %s2092_s29 }
  0x15   : > { %s164_s8 = sshll.u32 %s155_s7, 4  ;;  %p2464_p0 = pnand %p2173_p13, %p2430_p4  ;;  %s2460_s8 = int_to_ptr.vmem [resolvable:$true] %s164_s8 }
  0x16   : > { %s2469_s10 = scalar_lea.sflag [#allocation5], %s151_s28  ;;  %s2245_s11 = scalar_lea.hbm %s2458_s6, 1024 }
  0x17   : > { %p2246_p2 = scmp.ne.s32.totalorder %s2458_s6, %s2245_s11  ;;  %p2247_p3 = pneg %p2464_p0 }
  0x18   : > { %s2250_s21 = scalar_lea.hbm %s2966_s0, 2048  ;;  %p2251_p4 = scmp.lt.u32.totalorder %s2458_s6, %s2966_s0 }
  0x19   : > { %p2248_p5 = pnand %p2247_p3, %p2246_p2  ;;  %p2252_p7 = scmp.lt.u32.totalorder %s2250_s21, %s2245_s11 }
  0x1a   : > { %p2254_p13 = scmp.lt.u32.totalorder %s2245_s11, %s2458_s6 }
  0x1b   : > { %p2249_p6 = pneg %p2248_p5  ;;  %p2253_p10 = por %p2252_p7, %p2251_p4 }
  0x1d   : > { %p2255_p12 = por %p2254_p13, %p2253_p10 }
  0x1f   : > { %p2256_p1 = pnand %p2255_p12, %p2249_p6 }
  0x21   : > { %2259 = shalt.err (!%p2256_p1)
}
  0x22   : > { %s2260_s28 = scalar_lea.vmem %s2460_s8, 1024  ;;  %s2359_s29 = smov [#allocation4]  }
  0x23   : > { %p2261_p2 = scmp.ne.s32.totalorder %s2460_s8, %s2260_s28  ;;  %s2265_s30 = sshll.u32 %s2359_s29, 4  ;;  %s2266_s30 = int_to_ptr.vmem [resolvable:$false] %s2265_s30 }
  0x24   : > { %s2267_s4 = scalar_lea.vmem %s2266_s30, 2048  ;;  %p2268_p9 = scmp.lt.s32.totalorder %s2460_s8, %s2266_s30 }
  0x25   : > { %p2263_p5 = pnand %p2261_p2, %p2247_p3  ;;  %p2269_p4 = scmp.lt.s32.totalorder %s2267_s4, %s2260_s28 }
  0x27   : > { %p2264_p11 = pneg %p2263_p5  ;;  %p2270_p7 = por %p2269_p4, %p2268_p9 }
  0x29   : > { %p2271_p10 = pnand %p2270_p7, %p2264_p11 }
  0x2b   : > { %2274 = shalt.err (!%p2271_p10)
}
  0x2c   : > { %s2360_s5 = smov 128   ;;  %s2361_s7 = smov 8  }
  0x2d   : > { %2168 = dma.hbm_to_vmem [thread:$0]  (!%p2464_p0), %s2458_s6, 1024, %s2460_s8, %s2469_s10, %s2360_s5, %s2360_s5, %s2361_s7  }
  0x2e   : > { %p172_p12 = scmp.lt.s32.totalorder %s2357_s17, 3  ;;  %p2976_p1 = scmp.ge.s32.totalorder %s2357_s17, 1 }
  0x30   : > { %p173_p3 = pnand %p2976_p1, %p172_p12 }
  0x31   : > { %s2501_s11 = sand.u32 (!%p173_p3), 1, %s2341_s13  }
  0x32   : > { %176 = sbr.rel (%p173_p3) target bundleno = 916 (0x394), region = 32  ;;  %s2096_s18 = sshll.u32 (!%p173_p3), %s2501_s11, 6 }
  0x33   : > { %s179_s19 = scalar_lea.sflag (!%p173_p3), [#allocation5], %s2501_s11  ;;  %s2505_s21 = scalar_lea.vmem (!%p173_p3), [#allocation4], %s2096_s18 }
  0x39   : > { %2328 = dma.done.wait (%p2436_p8), %s179_s19, 1024  }
  0x3a   : > { %2330 = vsyncadd (%p2436_p8), %s179_s19, 4294966272  ;;  %v212_v0 = vld [vmem:[%s2505_s21] sm:$0xff]  ;;  %v213_v1 = vld [vmem:[%s2505_s21 + $0x8] sm:$0xff]  ;;  %v2362_v43 = vmov 0   ;;  %v269_v45 = vlaneseq  ;;  %v2363_v46 = vmov 1966171168  }
  0x3b   : > { %v2097_v2 = vcombine.low %v212_v0, %v213_v1  ;;  %v2098_v3 = vcombine.high %v212_v0, %v213_v1  ;;  %v221_v4 = vunpack.c.l.bf16 %v212_v0  ;;  %v222_v5 = vunpack.c.h.bf16 %v212_v0  ;;  %v214_v6 = vld [vmem:[%s2505_s21 + $0x10] sm:$0xff]  ;;  %v215_v7 = vld [vmem:[%s2505_s21 + $0x18] sm:$0xff]  ;;  %v216_v21 = vld [vmem:[%s2505_s21 + $0x20] sm:$0xff]  ;;  %2232 = vset.pattern.permute.xlu0 %v2362_v43  ;;  %2231 = vset.pattern.permute.xlu1 %v2362_v43  ;;  %s2110_s8 = sshll.u32 %s2349_s15, 4  ;;  %s203_s9 = scalar_lea.vmem [#allocation7], %s2501_s11 }
  0x3c   : > { %v223_v8 = vunpack.c.l.bf16 %v213_v1  ;;  %v224_v9 = vunpack.c.h.bf16 %v213_v1  ;;  %v2099_v12 = vcombine.low %v214_v6, %v215_v7  ;;  %v2100_v14 = vcombine.high %v214_v6, %v215_v7  ;;  %v217_v22 = vld [vmem:[%s2505_s21 + $0x28] sm:$0xff]  ;;  %v218_v32 = vld [vmem:[%s2505_s21 + $0x30] sm:$0xff]  ;;  %v219_v33 = vld [vmem:[%s2505_s21 + $0x38] sm:$0xff]  ;;  %s2011_s10 = sshll.u32 %s203_s9, 4  ;;  %s2916_s28 = scalar_lea.hbm %s2969_s3, %s2110_s8  ;;  %s2918_s10 = int_to_ptr.vmem [resolvable:$true] %s2011_s10 }
  0x3d   : > { %v1055_v10 = vmax.bf16 %v2098_v3, %v2097_v2  ;;  %v237_v11 = vadd.f32 %v222_v5, %v221_v4  ;;  %v225_v15 = vunpack.c.l.bf16 %v214_v6  ;;  %v226_v16 = vunpack.c.h.bf16 %v214_v6  ;;  %s1999_s29 = scalar_lea.sflag [#allocation6], %s2501_s11  ;;  %s2275_s30 = scalar_lea.vmem %s2918_s10, 16 }
  0x3e   : > { %v240_v13 = vadd.f32 %v224_v9, %v223_v8  ;;  %v1058_v17 = vmax.bf16 %v2100_v14, %v2099_v12  ;;  %v227_v19 = vunpack.c.l.bf16 %v215_v7  ;;  %v228_v20 = vunpack.c.h.bf16 %v215_v7  ;;  %p2276_p8 = scmp.ne.s32.totalorder %s2918_s10, %s2275_s30  ;;  %p2977_p9 = scmp.ne.s32.totalorder %s2973_s25, 0 }
  0x3f   : > { %1056 = vmax.xlane.bf16.xlu0 %v1055_v10  ;;  %238 = vadd.xlane.f32.xlu1 %v237_v11  ;;  %v243_v18 = vadd.f32 %v226_v16, %v225_v15  ;;  %v2101_v23 = vcombine.low %v216_v21, %v217_v22  ;;  %v2102_v25 = vcombine.high %v216_v21, %v217_v22  ;;  %v229_v26 = vunpack.c.l.bf16 %v216_v21  ;;  %s2368_s15 = smov [#allocation7]  }
  0x40   : > { %v246_v24 = vadd.f32 %v228_v20, %v227_v19  ;;  %v230_v27 = vunpack.c.h.bf16 %v216_v21  ;;  %v231_v30 = vunpack.c.l.bf16 %v217_v22  ;;  %v232_v31 = vunpack.c.h.bf16 %v217_v22  ;;  %p2277_p11 = pnand %p2276_p8, %p2977_p9  ;;  %s2279_s4 = sshll.u32 %s2368_s15, 4  ;;  %s2280_s4 = int_to_ptr.vmem [resolvable:$false] %s2279_s4 }
  0x41   : > { %v1061_v28 = vmax.bf16 %v2102_v25, %v2101_v23  ;;  %v2103_v34 = vcombine.low %v218_v32, %v219_v33  ;;  %v2104_v36 = vcombine.high %v218_v32, %v219_v33  ;;  %v233_v37 = vunpack.c.l.bf16 %v218_v32  ;;  %s2281_s5 = scalar_lea.vmem %s2280_s4, 32  ;;  %p2282_p6 = scmp.lt.s32.totalorder %s2918_s10, %s2280_s4 }
  0x42   : > { %v249_v29 = vadd.f32 %v230_v27, %v229_v26  ;;  %v252_v35 = vadd.f32 %v232_v31, %v231_v30  ;;  %v234_v38 = vunpack.c.h.bf16 %v218_v32  ;;  %v235_v41 = vunpack.c.l.bf16 %v219_v33  ;;  %p2278_p0 = pneg %p2277_p11  ;;  %p2283_p13 = scmp.lt.s32.totalorder %s2281_s5, %s2275_s30 }
  0x43   : > { %241 = vadd.xlane.f32.xlu1 %v240_v13  ;;  %v1064_v39 = vmax.bf16 %v2104_v36, %v2103_v34  ;;  %v236_v42 = vunpack.c.h.bf16 %v219_v33  ;;  %v530_v47 = vunpack.c.l.s4 %v2363_v46  ;;  %v2520_v48 = vshrl.u32 %v269_v45, 7 }
  0x44   : > { %v255_v40 = vadd.f32 %v234_v38, %v233_v37  ;;  %vm209_vm0 = vcmask 516096   ;;  %vm2367_vm1 = vmmov 0   ;;  %vm952_vm2 = vcmask 130112   ;;  %p2284_p2 = por %p2283_p13, %p2282_p6 }
  0x45   : > { %v258_v44 = vadd.f32 %v236_v42, %v235_v41  ;;  %v531_v49 = vunpack.c.0.s8 %v530_v47  ;;  %v2523_v50 = vsub.s32 0, %v2520_v48  ;;  %v2526_v51 = vsub.s32 1, %v2520_v48 }
  0x46   : > { %v2529_v52 = vsub.s32 2, %v2520_v48  ;;  %v2532_v53 = vsub.s32 3, %v2520_v48  ;;  %v2535_v54 = vsub.s32 4, %v2520_v48  ;;  %v2538_v55 = vsub.s32 5, %v2520_v48  ;;  %p2285_p5 = pnand %p2284_p2, %p2278_p0 }
  0x47   : > { %1059 = vmax.xlane.bf16.xlu0 %v1058_v17  ;;  %244 = vadd.xlane.f32.xlu1 %v243_v18  ;;  %v2541_v56 = vsub.s32 6, %v2520_v48  ;;  %v2544_v57 = vsub.s32 7, %v2520_v48  ;;  %v2547_v59 = vsub.s32 %v531_v49, %v2520_v48  ;;  %vm959_vm3 = vcmask 195712  }
  0x48   : > { %vm966_vm4 = vcmask 261312   ;;  %vm973_vm5 = vcmask 326912   ;;  %vm980_vm6 = vcmask 392512   ;;  %vm987_vm7 = vcmask 458112  }
  0x49   : > { %vm994_vm8 = vcmask 523712   ;;  %vm1823_vm9 = vcmask 1040384   ;;  %vm1833_vm10 = vcmask 523264   ;;  %vm1913_vm11 = vcmask 1043456  }
  0x4a   : > { %vm1909_vm12 = vcmask 31744  }
  0x4b   : > { %247 = vadd.xlane.f32.xlu1 %v246_v24 }
  0x4f   : > { %1062 = vmax.xlane.bf16.xlu0 %v1061_v28  ;;  %250 = vadd.xlane.f32.xlu1 %v249_v29 }
  0x53   : > { %253 = vadd.xlane.f32.xlu1 %v252_v35 }
  0x57   : > { %1065 = vmax.xlane.bf16.xlu0 %v1064_v39  ;;  %256 = vadd.xlane.f32.xlu1 %v255_v40 }
  0x5f   : > { %259 = vadd.xlane.f32.xlu0 %v258_v44 }
  0xcc   : > { %v239_v58 = vpop.xlane.xlu1 %238 }
  0xcd   : > { %v272_v60 = vrot.slane %v239_v58, %v2523_v50  ;;  %v276_v61 = vrot.slane %v239_v58, %v2526_v51  ;;  %v280_v62 = vrot.slane %v239_v58, %v2529_v52  ;;  %v284_v63 = vrot.slane %v239_v58, %v2532_v53 }
  0xce   : > { %v288_v0 = vrot.slane %v239_v58, %v2535_v54  ;;  %v292_v1 = vrot.slane %v239_v58, %v2538_v55  ;;  %v296_v2 = vrot.slane %v239_v58, %v2541_v56  ;;  %v300_v3 = vrot.slane %v239_v58, %v2544_v57 }
  0xcf   : > { %v525_v4 = vcombine.low %v272_v60, %v276_v61  ;;  %v526_v5 = vcombine.low %v280_v62, %v284_v63 }
  0xd0   : > { %v1057_v6 = vpop.xlane.xlu0 %1056  ;;  %v242_v7 = vpop.xlane.xlu1 %241  ;;  %v527_v8 = vcombine.low %v288_v0, %v292_v1  ;;  %v528_v9 = vcombine.low %v296_v2, %v300_v3 }
  0xd1   : > { %v2557_v10 = vunpack.c.l.bf16 %v1057_v6  ;;  %v2559_v11 = vunpack.c.h.bf16 %v1057_v6  ;;  %v535_v12 = vrot.slane %v525_v4, %v2547_v59  ;;  %v542_v13 = vrot.slane %v526_v5, %v2547_v59 }
  0xd2   : > { %v549_v14 = vrot.slane %v527_v8, %v2547_v59  ;;  %v556_v15 = vrot.slane %v528_v9, %v2547_v59  ;;  %v304_v16 = vrot.slane %v242_v7, %v2523_v50  ;;  %v308_v17 = vrot.slane %v242_v7, %v2526_v51 }
  0xd3   : > { %v557_v18 = vcombine.low %v535_v12, %v542_v13  ;;  %v312_v19 = vrot.slane %v242_v7, %v2529_v52  ;;  %v316_v20 = vrot.slane %v242_v7, %v2532_v53  ;;  %v320_v21 = vrot.slane %v242_v7, %v2535_v54 }
  0xd4   : > { %v245_v22 = vpop.xlane.xlu1 %244  ;;  %v558_v23 = vcombine.low %v549_v14, %v556_v15  ;;  %v324_v24 = vrot.slane %v242_v7, %v2538_v55  ;;  %v328_v25 = vrot.slane %v242_v7, %v2541_v56  ;;  %v332_v26 = vrot.slane %v242_v7, %v2544_v57 }
  0xd5   : > { %v565_v27 = vrot.slane %v557_v18, %v2547_v59  ;;  %v574_v28 = vcombine.low %v304_v16, %v308_v17  ;;  %v575_v29 = vcombine.low %v312_v19, %v316_v20  ;;  %v336_v30 = vrot.slane %v245_v22, %v2523_v50 }
  0xd6   : > { %v572_v31 = vrot.slane %v558_v23, %v2547_v59  ;;  %v576_v32 = vcombine.low %v320_v21, %v324_v24  ;;  %v577_v33 = vcombine.low %v328_v25, %v332_v26  ;;  %v340_v34 = vrot.slane %v245_v22, %v2526_v51 }
  0xd7   : > { %v584_v35 = vrot.slane %v574_v28, %v2547_v59  ;;  %v591_v36 = vrot.slane %v575_v29, %v2547_v59  ;;  %v344_v37 = vrot.slane %v245_v22, %v2529_v52  ;;  %v348_v38 = vrot.slane %v245_v22, %v2532_v53 }
  0xd8   : > { %v1060_v39 = vpop.xlane.xlu0 %1059  ;;  %v248_v40 = vpop.xlane.xlu1 %247  ;;  %v573_v41 = vcombine.low %v565_v27, %v572_v31  ;;  %v598_v42 = vrot.slane %v576_v32, %v2547_v59  ;;  %v605_v43 = vrot.slane %v577_v33, %v2547_v59  ;;  %v352_v44 = vrot.slane %v245_v22, %v2535_v54 }
  0xd9   : > { %v2584_v46 = vunpack.c.l.bf16 %v1060_v39  ;;  %v2586_v47 = vunpack.c.h.bf16 %v1060_v39  ;;  %v606_v49 = vcombine.low %v584_v35, %v591_v36  ;;  %v356_v58 = vrot.slane %v245_v22, %v2538_v55 }
  0xda   : > { %918 = vperm.xlu1 %2231, %v573_v41   ;;  %v607_v60 = vcombine.low %v598_v42, %v605_v43  ;;  %v360_v61 = vrot.slane %v245_v22, %v2541_v56  ;;  %v364_v62 = vrot.slane %v245_v22, %v2544_v57  ;;  %v623_v63 = vcombine.low %v336_v30, %v340_v34 }
  0xdb   : > { %v614_v0 = vrot.slane %v606_v49, %v2547_v59  ;;  %v624_v1 = vcombine.low %v344_v37, %v348_v38  ;;  %v625_v2 = vcombine.low %v352_v44, %v356_v58  ;;  %v368_v3 = vrot.slane %v248_v40, %v2523_v50 }
  0xdc   : > { %v621_v4 = vrot.slane %v607_v60, %v2547_v59  ;;  %v626_v5 = vcombine.low %v360_v61, %v364_v62  ;;  %v633_v6 = vrot.slane %v623_v63, %v2547_v59  ;;  %v372_v7 = vrot.slane %v248_v40, %v2526_v51  ;;  %v251_v8 = vpop.xlane.xlu1 %250 }
  0xdd   : > { %v640_v9 = vrot.slane %v624_v1, %v2547_v59  ;;  %v647_v12 = vrot.slane %v625_v2, %v2547_v59  ;;  %v376_v13 = vrot.slane %v248_v40, %v2529_v52  ;;  %v380_v14 = vrot.slane %v248_v40, %v2532_v53 }
  0xde   : > { %v622_v15 = vcombine.low %v614_v0, %v621_v4  ;;  %v654_v16 = vrot.slane %v626_v5, %v2547_v59  ;;  %v384_v17 = vrot.slane %v248_v40, %v2535_v54  ;;  %v388_v18 = vrot.slane %v248_v40, %v2538_v55 }
  0xdf   : > { %v655_v19 = vcombine.low %v633_v6, %v640_v9  ;;  %v392_v20 = vrot.slane %v248_v40, %v2541_v56  ;;  %v396_v21 = vrot.slane %v248_v40, %v2544_v57  ;;  %v672_v22 = vcombine.low %v368_v3, %v372_v7 }
  0xe0   : > { %921 = vperm.xlu0 %2232, %v622_v15   ;;  %v1063_v23 = vpop.xlane.xlu0 %1062  ;;  %v656_v24 = vcombine.low %v647_v12, %v654_v16  ;;  %v673_v25 = vcombine.low %v376_v13, %v380_v14  ;;  %v674_v26 = vcombine.low %v384_v17, %v388_v18  ;;  %v400_v27 = vrot.slane %v251_v8, %v2523_v50  ;;  %v254_v36 = vpop.xlane.xlu1 %253 }
  0xe1   : > { %v2606_v28 = vunpack.c.l.bf16 %v1063_v23  ;;  %v2608_v29 = vunpack.c.h.bf16 %v1063_v23  ;;  %v663_v30 = vrot.slane %v655_v19, %v2547_v59  ;;  %v675_v31 = vcombine.low %v392_v20, %v396_v21 }
  0xe2   : > { %v670_v32 = vrot.slane %v656_v24, %v2547_v59  ;;  %v682_v33 = vrot.slane %v672_v22, %v2547_v59  ;;  %v689_v34 = vrot.slane %v673_v25, %v2547_v59  ;;  %v696_v35 = vrot.slane %v674_v26, %v2547_v59 }
  0xe3   : > { %v703_v37 = vrot.slane %v675_v31, %v2547_v59  ;;  %v404_v38 = vrot.slane %v251_v8, %v2526_v51  ;;  %v408_v39 = vrot.slane %v251_v8, %v2529_v52  ;;  %v412_v40 = vrot.slane %v251_v8, %v2532_v53 }
  0xe4   : > { %v671_v41 = vcombine.low %v663_v30, %v670_v32  ;;  %v704_v42 = vcombine.low %v682_v33, %v689_v34  ;;  %v416_v43 = vrot.slane %v251_v8, %v2535_v54  ;;  %v420_v44 = vrot.slane %v251_v8, %v2538_v55 }
  0xe5   : > { %v705_v49 = vcombine.low %v696_v35, %v703_v37  ;;  %v424_v58 = vrot.slane %v251_v8, %v2541_v56  ;;  %v428_v60 = vrot.slane %v251_v8, %v2544_v57  ;;  %v721_v61 = vcombine.low %v400_v27, %v404_v38  ;;  %v257_v35 = vpop.xlane.xlu1 %256 }
  0xe6   : > { %924 = vperm.xlu1 %2231, %v671_v41   ;;  %v712_v62 = vrot.slane %v704_v42, %v2547_v59  ;;  %v722_v63 = vcombine.low %v408_v39, %v412_v40  ;;  %v723_v0 = vcombine.low %v416_v43, %v420_v44  ;;  %v432_v1 = vrot.slane %v254_v36, %v2523_v50 }
  0xe7   : > { %v719_v2 = vrot.slane %v705_v49, %v2547_v59  ;;  %v724_v3 = vcombine.low %v424_v58, %v428_v60  ;;  %v731_v4 = vrot.slane %v721_v61, %v2547_v59  ;;  %v436_v5 = vrot.slane %v254_v36, %v2526_v51 }
  0xe8   : > { %v1066_v6 = vpop.xlane.xlu0 %1065  ;;  %v738_v7 = vrot.slane %v722_v63, %v2547_v59  ;;  %v745_v8 = vrot.slane %v723_v0, %v2547_v59  ;;  %v440_v9 = vrot.slane %v254_v36, %v2529_v52  ;;  %v444_v12 = vrot.slane %v254_v36, %v2532_v53 }
  0xe9   : > { %v720_v13 = vcombine.low %v712_v62, %v719_v2  ;;  %v2632_v14 = vunpack.c.l.bf16 %v1066_v6  ;;  %v2634_v15 = vunpack.c.h.bf16 %v1066_v6  ;;  %v752_v16 = vrot.slane %v724_v3, %v2547_v59 }
  0xea   : > { %v753_v17 = vcombine.low %v731_v4, %v738_v7  ;;  %v448_v18 = vrot.slane %v254_v36, %v2535_v54  ;;  %v452_v19 = vrot.slane %v254_v36, %v2538_v55  ;;  %v456_v20 = vrot.slane %v254_v36, %v2541_v56 }
  0xeb   : > { %927 = vperm.xlu1 %2231, %v720_v13   ;;  %v754_v21 = vcombine.low %v745_v8, %v752_v16  ;;  %v460_v22 = vrot.slane %v254_v36, %v2544_v57  ;;  %v770_v23 = vcombine.low %v432_v1, %v436_v5  ;;  %v771_v24 = vcombine.low %v440_v9, %v444_v12 }
  0xec   : > { %v761_v25 = vrot.slane %v753_v17, %v2547_v59  ;;  %v772_v26 = vcombine.low %v448_v18, %v452_v19  ;;  %v1214_v27 = vrot.slane %v2606_v28, %v2523_v50  ;;  %v1218_v30 = vrot.slane %v2606_v28, %v2526_v51 }
  0xed   : > { %v768_v31 = vrot.slane %v754_v21, %v2547_v59  ;;  %v773_v32 = vcombine.low %v456_v20, %v460_v22  ;;  %v780_v33 = vrot.slane %v770_v23, %v2547_v59  ;;  %v787_v34 = vrot.slane %v771_v24, %v2547_v59 }
  0xee   : > { %v794_v36 = vrot.slane %v772_v26, %v2547_v59  ;;  %v1222_v37 = vrot.slane %v2606_v28, %v2529_v52  ;;  %v1226_v38 = vrot.slane %v2606_v28, %v2532_v53  ;;  %v1230_v39 = vrot.slane %v2606_v28, %v2535_v54 }
  0xef   : > { %v769_v40 = vcombine.low %v761_v25, %v768_v31  ;;  %v801_v41 = vrot.slane %v773_v32, %v2547_v59  ;;  %v802_v42 = vcombine.low %v780_v33, %v787_v34  ;;  %v1234_v43 = vrot.slane %v2606_v28, %v2538_v55 }
  0xf0   : > { %v1238_v44 = vrot.slane %v2606_v28, %v2541_v56  ;;  %v1242_v49 = vrot.slane %v2606_v28, %v2544_v57  ;;  %v1535_v58 = vcombine.low %v1214_v27, %v1218_v30  ;;  %v1536_v60 = vcombine.low %v1222_v37, %v1226_v38 }
  0xf1   : > { %930 = vperm.xlu1 %2231, %v769_v40   ;;  %v803_v61 = vcombine.low %v794_v36, %v801_v41  ;;  %v810_v62 = vrot.slane %v802_v42, %v2547_v59  ;;  %v1537_v63 = vcombine.low %v1230_v39, %v1234_v43  ;;  %v464_v0 = vrot.slane %v257_v35, %v2523_v50 }
  0xf2   : > { %v1538_v1 = vcombine.low %v1238_v44, %v1242_v49  ;;  %v1545_v2 = vrot.slane %v1535_v58, %v2547_v59  ;;  %v1552_v3 = vrot.slane %v1536_v60, %v2547_v59  ;;  %v468_v4 = vrot.slane %v257_v35, %v2526_v51 }
  0xf3   : > { %v817_v5 = vrot.slane %v803_v61, %v2547_v59  ;;  %v1559_v28 = vrot.slane %v1537_v63, %v2547_v59  ;;  %v472_v6 = vrot.slane %v257_v35, %v2529_v52  ;;  %v476_v7 = vrot.slane %v257_v35, %v2532_v53 }
  0xf4   : > { %v1566_v8 = vrot.slane %v1538_v1, %v2547_v59  ;;  %v1567_v9 = vcombine.low %v1545_v2, %v1552_v3  ;;  %v480_v12 = vrot.slane %v257_v35, %v2535_v54  ;;  %v484_v13 = vrot.slane %v257_v35, %v2538_v55  ;;  %v260_v2 = vpop.xlane.xlu0 %259 }
  0xf5   : > { %v818_v16 = vcombine.low %v810_v62, %v817_v5  ;;  %v488_v17 = vrot.slane %v257_v35, %v2541_v56  ;;  %v492_v18 = vrot.slane %v257_v35, %v2544_v57  ;;  %v819_v19 = vcombine.low %v464_v0, %v468_v4 }
  0xf6   : > { %v1568_v20 = vcombine.low %v1559_v28, %v1566_v8  ;;  %v1575_v21 = vrot.slane %v1567_v9, %v2547_v59  ;;  %v820_v22 = vcombine.low %v472_v6, %v476_v7  ;;  %v821_v23 = vcombine.low %v480_v12, %v484_v13 }
  0xf7   : > { %933 = vperm.xlu1 %2231, %v818_v16   ;;  %v822_v24 = vcombine.low %v488_v17, %v492_v18  ;;  %v829_v25 = vrot.slane %v819_v19, %v2547_v59  ;;  %v1246_v26 = vrot.slane %v2608_v29, %v2523_v50  ;;  %v1250_v27 = vrot.slane %v2608_v29, %v2526_v51 }
  0xf8   : > { %v1582_v30 = vrot.slane %v1568_v20, %v2547_v59  ;;  %v836_v31 = vrot.slane %v820_v22, %v2547_v59  ;;  %v843_v32 = vrot.slane %v821_v23, %v2547_v59  ;;  %v1254_v33 = vrot.slane %v2608_v29, %v2529_v52 }
  0xf9   : > { %v850_v34 = vrot.slane %v822_v24, %v2547_v59  ;;  %v1258_v35 = vrot.slane %v2608_v29, %v2532_v53  ;;  %v1262_v36 = vrot.slane %v2608_v29, %v2535_v54  ;;  %v1266_v37 = vrot.slane %v2608_v29, %v2538_v55 }
  0xfa   : > { %v1583_v38 = vcombine.low %v1575_v21, %v1582_v30  ;;  %v851_v39 = vcombine.low %v829_v25, %v836_v31  ;;  %v1270_v40 = vrot.slane %v2608_v29, %v2541_v56  ;;  %v1274_v41 = vrot.slane %v2608_v29, %v2544_v57 }
  0xfb   : > { %v852_v42 = vcombine.low %v843_v32, %v850_v34  ;;  %v1584_v43 = vcombine.low %v1246_v26, %v1250_v27  ;;  %v1585_v44 = vcombine.low %v1254_v33, %v1258_v35  ;;  %v1586_v49 = vcombine.low %v1262_v36, %v1266_v37 }
  0xfc   : > { %1744 = vperm.xlu0 %2232, %v1583_v38   ;;  %v859_v58 = vrot.slane %v851_v39, %v2547_v59  ;;  %v1587_v60 = vcombine.low %v1270_v40, %v1274_v41  ;;  %v1310_v61 = vrot.slane %v2634_v15, %v2523_v50  ;;  %v1314_v62 = vrot.slane %v2634_v15, %v2526_v51 }
  0xfd   : > { %v866_v63 = vrot.slane %v852_v42, %v2547_v59  ;;  %v1594_v0 = vrot.slane %v1584_v43, %v2547_v59  ;;  %v1601_v29 = vrot.slane %v1585_v44, %v2547_v59  ;;  %v1608_v1 = vrot.slane %v1586_v49, %v2547_v59 }
  0xfe   : > { %v1615_v3 = vrot.slane %v1587_v60, %v2547_v59  ;;  %v1318_v4 = vrot.slane %v2634_v15, %v2529_v52  ;;  %v1322_v5 = vrot.slane %v2634_v15, %v2532_v53  ;;  %v1326_v28 = vrot.slane %v2634_v15, %v2535_v54 }
  0xff   : > { %v867_v6 = vcombine.low %v859_v58, %v866_v63  ;;  %v1616_v7 = vcombine.low %v1594_v0, %v1601_v29  ;;  %v1330_v8 = vrot.slane %v2634_v15, %v2538_v55  ;;  %v1334_v9 = vrot.slane %v2634_v15, %v2541_v56 }
 0x100   : > { %v1617_v12 = vcombine.low %v1608_v1, %v1615_v3  ;;  %v1338_v13 = vrot.slane %v2634_v15, %v2544_v57  ;;  %v1682_v16 = vcombine.low %v1310_v61, %v1314_v62  ;;  %v1683_v17 = vcombine.low %v1318_v4, %v1322_v5 }
 0x101   : > { %936 = vperm.xlu1 %2231, %v867_v6   ;;  %v1624_v18 = vrot.slane %v1616_v7, %v2547_v59  ;;  %v1684_v19 = vcombine.low %v1326_v28, %v1330_v8  ;;  %v496_v20 = vrot.slane %v260_v2, %v2523_v50  ;;  %v500_v21 = vrot.slane %v260_v2, %v2526_v51 }
 0x102   : > { %v1631_v22 = vrot.slane %v1617_v12, %v2547_v59  ;;  %v1685_v23 = vcombine.low %v1334_v9, %v1338_v13  ;;  %v1692_v24 = vrot.slane %v1682_v16, %v2547_v59  ;;  %v1699_v25 = vrot.slane %v1683_v17, %v2547_v59 }
 0x103   : > { %v1706_v26 = vrot.slane %v1684_v19, %v2547_v59  ;;  %v504_v15 = vrot.slane %v260_v2, %v2529_v52  ;;  %v508_v27 = vrot.slane %v260_v2, %v2532_v53  ;;  %v512_v30 = vrot.slane %v260_v2, %v2535_v54 }
 0x104   : > { %v1632_v31 = vcombine.low %v1624_v18, %v1631_v22  ;;  %v1713_v32 = vrot.slane %v1685_v23, %v2547_v59  ;;  %v1714_v33 = vcombine.low %v1692_v24, %v1699_v25  ;;  %v516_v34 = vrot.slane %v260_v2, %v2538_v55 }
 0x105   : > { %v520_v35 = vrot.slane %v260_v2, %v2541_v56  ;;  %v524_v36 = vrot.slane %v260_v2, %v2544_v57  ;;  %v868_v37 = vcombine.low %v496_v20, %v500_v21  ;;  %v869_v38 = vcombine.low %v504_v15, %v508_v27 }
 0x106   : > { %1747 = vperm.xlu0 %2232, %v1632_v31   ;;  %v1715_v39 = vcombine.low %v1706_v26, %v1713_v32  ;;  %v1722_v40 = vrot.slane %v1714_v33, %v2547_v59  ;;  %v870_v41 = vcombine.low %v512_v30, %v516_v34  ;;  %v1086_v42 = vrot.slane %v2557_v10, %v2523_v50 }
 0x107   : > { %v871_v43 = vcombine.low %v520_v35, %v524_v36  ;;  %v878_v44 = vrot.slane %v868_v37, %v2547_v59  ;;  %v885_v49 = vrot.slane %v869_v38, %v2547_v59  ;;  %v1090_v58 = vrot.slane %v2557_v10, %v2526_v51 }
 0x108   : > { %v1729_v60 = vrot.slane %v1715_v39, %v2547_v59  ;;  %v892_v61 = vrot.slane %v870_v41, %v2547_v59  ;;  %v1094_v62 = vrot.slane %v2557_v10, %v2529_v52  ;;  %v1098_v63 = vrot.slane %v2557_v10, %v2532_v53 }
 0x109   : > { %v899_v0 = vrot.slane %v871_v43, %v2547_v59  ;;  %v900_v29 = vcombine.low %v878_v44, %v885_v49  ;;  %v1102_v1 = vrot.slane %v2557_v10, %v2535_v54  ;;  %v1106_v2 = vrot.slane %v2557_v10, %v2538_v55 }
 0x10a   : > { %v1730_v3 = vcombine.low %v1722_v40, %v1729_v60  ;;  %v1110_v4 = vrot.slane %v2557_v10, %v2541_v56  ;;  %v1114_v5 = vrot.slane %v2557_v10, %v2544_v57  ;;  %v1339_v28 = vcombine.low %v1086_v42, %v1090_v58 }
 0x10b   : > { %v901_v6 = vcombine.low %v892_v61, %v899_v0  ;;  %v908_v7 = vrot.slane %v900_v29, %v2547_v59  ;;  %v1340_v8 = vcombine.low %v1094_v62, %v1098_v63  ;;  %v1341_v9 = vcombine.low %v1102_v1, %v1106_v2 }
 0x10c   : > { %1753 = vperm.xlu0 %2232, %v1730_v3   ;;  %v1342_v12 = vcombine.low %v1110_v4, %v1114_v5  ;;  %v1349_v13 = vrot.slane %v1339_v28, %v2547_v59  ;;  %v1118_v16 = vrot.slane %v2559_v11, %v2523_v50  ;;  %v1122_v17 = vrot.slane %v2559_v11, %v2526_v51 }
 0x10d   : > { %v915_v18 = vrot.slane %v901_v6, %v2547_v59  ;;  %v1356_v10 = vrot.slane %v1340_v8, %v2547_v59  ;;  %v1363_v19 = vrot.slane %v1341_v9, %v2547_v59  ;;  %v1126_v20 = vrot.slane %v2559_v11, %v2529_v52 }
 0x10e   : > { %v1370_v21 = vrot.slane %v1342_v12, %v2547_v59  ;;  %v1130_v22 = vrot.slane %v2559_v11, %v2532_v53  ;;  %v1134_v23 = vrot.slane %v2559_v11, %v2535_v54  ;;  %v1138_v24 = vrot.slane %v2559_v11, %v2538_v55 }
 0x10f   : > { %v916_v25 = vcombine.low %v908_v7, %v915_v18  ;;  %v1371_v26 = vcombine.low %v1349_v13, %v1356_v10  ;;  %v1142_v15 = vrot.slane %v2559_v11, %v2541_v56  ;;  %v1146_v27 = vrot.slane %v2559_v11, %v2544_v57 }
 0x110   : > { %v1372_v30 = vcombine.low %v1363_v19, %v1370_v21  ;;  %v1388_v31 = vcombine.low %v1118_v16, %v1122_v17  ;;  %v1389_v32 = vcombine.low %v1126_v20, %v1130_v22  ;;  %v1390_v33 = vcombine.low %v1134_v23, %v1138_v24 }
 0x111   : > { %939 = vperm.xlu1 %2231, %v916_v25   ;;  %v1379_v34 = vrot.slane %v1371_v26, %v2547_v59  ;;  %v1391_v35 = vcombine.low %v1142_v15, %v1146_v27  ;;  %v1150_v36 = vrot.slane %v2584_v46, %v2523_v50  ;;  %v1154_v37 = vrot.slane %v2584_v46, %v2526_v51 }
 0x112   : > { %v1386_v38 = vrot.slane %v1372_v30, %v2547_v59  ;;  %v1398_v39 = vrot.slane %v1388_v31, %v2547_v59  ;;  %v1405_v11 = vrot.slane %v1389_v32, %v2547_v59  ;;  %v1412_v40 = vrot.slane %v1390_v33, %v2547_v59 }
 0x113   : > { %v1419_v41 = vrot.slane %v1391_v35, %v2547_v59  ;;  %v1158_v42 = vrot.slane %v2584_v46, %v2529_v52  ;;  %v1162_v43 = vrot.slane %v2584_v46, %v2532_v53  ;;  %v1166_v44 = vrot.slane %v2584_v46, %v2535_v54 }
 0x114   : > { %v1387_v49 = vcombine.low %v1379_v34, %v1386_v38  ;;  %v1420_v58 = vcombine.low %v1398_v39, %v1405_v11  ;;  %v1170_v60 = vrot.slane %v2584_v46, %v2538_v55  ;;  %v1174_v61 = vrot.slane %v2584_v46, %v2541_v56 }
 0x115   : > { %v1421_v62 = vcombine.low %v1412_v40, %v1419_v41  ;;  %v1178_v63 = vrot.slane %v2584_v46, %v2544_v57  ;;  %v1437_v0 = vcombine.low %v1150_v36, %v1154_v37  ;;  %v1438_v29 = vcombine.low %v1158_v42, %v1162_v43 }
 0x116   : > { %1732 = vperm.xlu1 %2231, %v1387_v49   ;;  %v1428_v1 = vrot.slane %v1420_v58, %v2547_v59  ;;  %v1439_v2 = vcombine.low %v1166_v44, %v1170_v60  ;;  %v1182_v3 = vrot.slane %v2586_v47, %v2523_v50  ;;  %v1186_v4 = vrot.slane %v2586_v47, %v2526_v51 }
 0x117   : > { %v1435_v5 = vrot.slane %v1421_v62, %v2547_v59  ;;  %v1440_v28 = vcombine.low %v1174_v61, %v1178_v63  ;;  %v1447_v6 = vrot.slane %v1437_v0, %v2547_v59  ;;  %v1454_v7 = vrot.slane %v1438_v29, %v2547_v59  ;;  %v1825_v62 = vld [vmem:[%s2967_s1] sm:$0xff]  ;;  %v1826_v63 = vld [vmem:[%s2967_s1 + $0x8] sm:$0xff]  ;;  %v1827_v0 = vld [vmem:[%s2967_s1 + $0x10] sm:$0xff] }
 0x118   : > { %v1461_v46 = vrot.slane %v1439_v2, %v2547_v59  ;;  %v1190_v8 = vrot.slane %v2586_v47, %v2529_v52  ;;  %v1194_v9 = vrot.slane %v2586_v47, %v2532_v53  ;;  %v1198_v12 = vrot.slane %v2586_v47, %v2535_v54  ;;  %v1828_v2 = vld [vmem:[%s2967_s1 + $0x18] sm:$0xff] }
 0x119   : > { %v1436_v13 = vcombine.low %v1428_v1, %v1435_v5  ;;  %v1468_v16 = vrot.slane %v1440_v28, %v2547_v59  ;;  %v1469_v17 = vcombine.low %v1447_v6, %v1454_v7  ;;  %v1202_v18 = vrot.slane %v2586_v47, %v2538_v55  ;;  %v1829_v5 = vld [vmem:[%s2967_s1 + $0x20] sm:$0xff]  ;;  %v1830_v28 = vld [vmem:[%s2967_s1 + $0x28] sm:$0xff]  ;;  %v1831_v7 = vld [vmem:[%s2967_s1 + $0x30] sm:$0xff] }
 0x11a   : > { %v1206_v10 = vrot.slane %v2586_v47, %v2541_v56  ;;  %v1210_v19 = vrot.slane %v2586_v47, %v2544_v57  ;;  %v1486_v20 = vcombine.low %v1182_v3, %v1186_v4  ;;  %v1487_v21 = vcombine.low %v1190_v8, %v1194_v9 }
 0x11b   : > { %1735 = vperm.xlu1 %2231, %v1436_v13   ;;  %v1470_v22 = vcombine.low %v1461_v46, %v1468_v16  ;;  %v1477_v23 = vrot.slane %v1469_v17, %v2547_v59  ;;  %v1488_v24 = vcombine.low %v1198_v12, %v1202_v18  ;;  %v1278_v25 = vrot.slane %v2632_v14, %v2523_v50  ;;  %v1832_v46 = vld [vmem:[%s2967_s1 + $0x38] sm:$0xff] }
 0x11c   : > { %v1489_v26 = vcombine.low %v1206_v10, %v1210_v19  ;;  %v1496_v15 = vrot.slane %v1486_v20, %v2547_v59  ;;  %v1503_v27 = vrot.slane %v1487_v21, %v2547_v59  ;;  %v1282_v30 = vrot.slane %v2632_v14, %v2526_v51 }
 0x11d   : > { %v1484_v47 = vrot.slane %v1470_v22, %v2547_v59  ;;  %v1510_v31 = vrot.slane %v1488_v24, %v2547_v59  ;;  %v1286_v32 = vrot.slane %v2632_v14, %v2529_v52  ;;  %v1290_v33 = vrot.slane %v2632_v14, %v2532_v53 }
 0x11e   : > { %v1517_v50 = vrot.slane %v1489_v26, %v2547_v59  ;;  %v1518_v34 = vcombine.low %v1496_v15, %v1503_v27  ;;  %v1294_v35 = vrot.slane %v2632_v14, %v2535_v54  ;;  %v1298_v36 = vrot.slane %v2632_v14, %v2538_v55 }
 0x11f   : > { %v1485_v51 = vcombine.low %v1477_v23, %v1484_v47  ;;  %v1302_v37 = vrot.slane %v2632_v14, %v2541_v56  ;;  %v1306_v38 = vrot.slane %v2632_v14, %v2544_v57  ;;  %v1633_v52 = vcombine.low %v1278_v25, %v1282_v30 }
 0x120   : > { %v1519_v39 = vcombine.low %v1510_v31, %v1517_v50  ;;  %v1526_v53 = vrot.slane %v1518_v34, %v2547_v59  ;;  %v1634_v11 = vcombine.low %v1286_v32, %v1290_v33  ;;  %v1635_v40 = vcombine.low %v1294_v35, %v1298_v36 }
 0x121   : > { %1738 = vperm.xlu1 %2231, %v1485_v51   ;;  %v1636_v41 = vcombine.low %v1302_v37, %v1306_v38  ;;  %v1643_v54 = vrot.slane %v1633_v52, %v2547_v59  ;;  %v2364_v61 = vmov -inf   ;;  %v2365_v29 = vmov 0.0|0.0  }
 0x122   : > { %v1533_v42 = vrot.slane %v1519_v39, %v2547_v59  ;;  %v1650_v55 = vrot.slane %v1634_v11, %v2547_v59  ;;  %v1657_v43 = vrot.slane %v1635_v40, %v2547_v59  ;;  %211 = vst.msk [vmem:[#allocation3] sm:$0x1] %vm209_vm0, %v2364_v61  ;;  %2149 = vmatprep.subr.bf16.mxu0 %v2365_v29  ;;  %v2366_v3 = vmov 0.0  }
 0x123   : > { %v1664_v56 = vrot.slane %v1636_v41, %v2547_v59  ;;  %v2150_v1 = vpack.c.bf16 %v1826_v63, %v1825_v62  ;;  %210 = vst.msk [vmem:[#allocation2] sm:$0x1] %vm209_vm0, %v2366_v3  ;;  %2141 = vmatprep.mubr.msk.f32.mxu0 %vm2367_vm1, %v2366_v3  ;;  %2144 = vmatprep.subr.mxu1 %v2366_v3  ;;  %v942_v16 = vand.u32 127, %v269_v45 }
 0x124   : > { %v1534_v44 = vcombine.low %v1526_v53, %v1533_v42  ;;  %v1665_v57 = vcombine.low %v1643_v54, %v1650_v55  ;;  %2146 = vmatprep.mubr.msk.f32.mxu1 %vm2367_vm1, %v2366_v3  ;;  %v2153_v4 = vpack.c.bf16 %v1828_v2, %v1827_v0  ;;  %v2156_v6 = vpack.c.bf16 %v1830_v28, %v1829_v5 }
 0x125   : > { %v1666_v14 = vcombine.low %v1657_v43, %v1664_v56  ;;  %2151 = vmatpush3.bf16.msra.mxu0 %v2150_v1  ;;  %v2159_v8 = vpack.c.bf16 %v1832_v46, %v1831_v7  ;;  %v947_v18 = vadd.s32 4294967288, %v942_v16  ;;  %v954_v10 = vadd.s32 4294967280, %v942_v16 }
 0x126   : > { %1741 = vperm.xlu1 %2231, %v1534_v44   ;;  %v1673_v49 = vrot.slane %v1665_v57, %v2547_v59  ;;  %2152 = vmatprep.subr.bf16.mxu0 %v2365_v29  ;;  %v961_v19 = vadd.s32 4294967272, %v942_v16  ;;  %v968_v20 = vadd.s32 4294967264, %v942_v16  ;;  %v945_v22 = vsub.s32 %v942_v16, %v2520_v48 }
 0x127   : > { %v1680_v58 = vrot.slane %v1666_v14, %v2547_v59  ;;  %v950_v21 = vsub.s32 %v947_v18, %v2520_v48  ;;  %v975_v23 = vadd.s32 4294967256, %v942_v16  ;;  %v957_v26 = vsub.s32 %v954_v10, %v2520_v48 }
 0x128   : > { %v982_v15 = vadd.s32 4294967248, %v942_v16  ;;  %v964_v27 = vsub.s32 %v961_v19, %v2520_v48  ;;  %v971_v30 = vsub.s32 %v968_v20, %v2520_v48  ;;  %v989_v35 = vadd.s32 4294967240, %v942_v16 }
 0x129   : > { %v1681_v60 = vcombine.low %v1673_v49, %v1680_v58  ;;  %2154 = vmatpush3.bf16.msra.mxu0 %v2153_v4  ;;  %v978_v31 = vsub.s32 %v975_v23, %v2520_v48  ;;  %v1908_v23 = vld [vmem:[%s2968_s2] sm:$0xf] }
 0x12a   : > { %2155 = vmatprep.subr.bf16.mxu0 %v2365_v29  ;;  %v985_v33 = vsub.s32 %v982_v15, %v2520_v48  ;;  %v992_v53 = vsub.s32 %v989_v35, %v2520_v48  ;;  %v220_v44 = vld [vmem:[#allocation2] sm:$0x1]  ;;  %2145 = vmatpush3.msk.msra.mxu1 %vm1913_vm11, %v1908_v23 }
 0x12b   : > { %1750 = vperm.xlu1 %2231, %v1681_v60  }
 0x12d   : > { %2157 = vmatpush3.bf16.msra.mxu0 %v2156_v6 }
 0x12e   : > { %2158 = vmatprep.subr.bf16.mxu0 %v2365_v29 }
 0x131   : > { %2160 = vmatpush3.bf16.msra.mxu0 %v2159_v8 }
 0x159   : > { %v919_v9 = vpop.permute.xlu1 %918 }
 0x15a   : > { %v946_v47 = vrot.slane %v919_v9, %v945_v22 }
 0x15f   : > { %v922_v25 = vpop.permute.xlu0 %921 }
 0x160   : > { %v951_v45 = vrot.slane %v922_v25, %v950_v21 }
 0x162   : > { %v953_v51 = vsel %vm952_vm2, %v951_v45, %v946_v47 }
 0x165   : > { %v925_v12 = vpop.permute.xlu1 %924 }
 0x166   : > { %v958_v32 = vrot.slane %v925_v12, %v957_v26 }
 0x168   : > { %v960_v38 = vsel %vm959_vm3, %v958_v32, %v953_v51 }
 0x16a   : > { %v928_v13 = vpop.permute.xlu1 %927 }
 0x16b   : > { %v965_v50 = vrot.slane %v928_v13, %v964_v27 }
 0x16d   : > { %v967_v39 = vsel %vm966_vm4, %v965_v50, %v960_v38 }
 0x170   : > { %v931_v17 = vpop.permute.xlu1 %930 }
 0x171   : > { %v972_v36 = vrot.slane %v931_v17, %v971_v30  ;;  %v1014_v17 = vld [vmem:[#allocation3] sm:$0x1] }
 0x173   : > { %v974_v11 = vsel %vm973_vm5, %v972_v36, %v967_v39 }
 0x176   : > { %v934_v24 = vpop.permute.xlu1 %933 }
 0x177   : > { %v979_v37 = vrot.slane %v934_v24, %v978_v31 }
 0x179   : > { %v981_v41 = vsel %vm980_vm6, %v979_v37, %v974_v11 }
 0x17b   : > { %v1745_v48 = vpop.permute.xlu0 %1744 }
 0x17c   : > { %v1777_v2 = vrot.slane %v1745_v48, %v971_v30 }
 0x180   : > { %v937_v34 = vpop.permute.xlu1 %936 }
 0x181   : > { %v986_v52 = vrot.slane %v937_v34, %v985_v33 }
 0x183   : > { %v988_v42 = vsel %vm987_vm7, %v986_v52, %v981_v41 }
 0x185   : > { %v1748_v61 = vpop.permute.xlu0 %1747 }
 0x186   : > { %v1782_v4 = vrot.slane %v1748_v61, %v978_v31 }
 0x18b   : > { %v1754_v28 = vpop.permute.xlu0 %1753 }
 0x18c   : > { %v1792_v9 = vrot.slane %v1754_v28, %v992_v53 }
 0x190   : > { %v940_v40 = vpop.permute.xlu1 %939 }
 0x191   : > { %v993_v54 = vrot.slane %v940_v40, %v992_v53 }
 0x193   : > { %v995_v55 = vsel %vm994_vm8, %v993_v54, %v988_v42 }
 0x194   : > { %v1002_v43 = vrot.slane %v995_v55, %v2547_v59 }
 0x195   : > { %v1733_v56 = vpop.permute.xlu1 %1732 }
 0x196   : > { %v1009_v57 = vrot.slane %v1002_v43, %v2547_v59  ;;  %v1758_v63 = vrot.slane %v1733_v56, %v945_v22 }
 0x198   : > { %v1011_v14 = vadd.f32 %v1009_v57, %v220_v44 }
 0x19a   : > { %v1736_v49 = vpop.permute.xlu1 %1735  ;;  %1013 = vst.msk [vmem:[#allocation2] sm:$0x1] %vm209_vm0, %v1011_v14 }
 0x19b   : > { %v1762_v60 = vrot.slane %v1736_v49, %v950_v21 }
 0x19d   : > { %v1763_v29 = vsel %vm952_vm2, %v1762_v60, %v1758_v63 }
 0x1a0   : > { %v1739_v58 = vpop.permute.xlu1 %1738 }
 0x1a1   : > { %v1767_v62 = vrot.slane %v1739_v58, %v957_v26  ;;  %v1814_v19 = vld [vmem:[#allocation2] sm:$0x1] }
 0x1a2   : > { %v1815_v20 = vmul.f32 0.00390625, %v1814_v19 }
 0x1a3   : > { %v1768_v3 = vsel %vm959_vm3, %v1767_v62, %v1763_v29 }
 0x1a5   : > { %v1742_v0 = vpop.permute.xlu1 %1741 }
 0x1a6   : > { %v1772_v1 = vrot.slane %v1742_v0, %v964_v27 }
 0x1a8   : > { %v1773_v5 = vsel %vm966_vm4, %v1772_v1, %v1768_v3 }
 0x1a9   : > { %v1778_v6 = vsel %vm973_vm5, %v1777_v2, %v1773_v5 }
 0x1aa   : > { %v1783_v7 = vsel %vm980_vm6, %v1782_v4, %v1778_v6  ;;  %v1751_v46 = vpop.permute.xlu1 %1750 }
 0x1ab   : > { %v1787_v8 = vrot.slane %v1751_v46, %v985_v33 }
 0x1ad   : > { %v1788_v12 = vsel %vm987_vm7, %v1787_v8, %v1783_v7 }
 0x1ae   : > { %v1793_v13 = vsel %vm994_vm8, %v1792_v9, %v1788_v12 }
 0x1af   : > { %v1800_v16 = vrot.slane %v1793_v13, %v2547_v59 }
 0x1b1   : > { %v1807_v18 = vrot.slane %v1800_v16, %v2547_v59 }
 0x1b3   : > { %v1809_v10 = vmax.f32 %v1014_v17, %v1807_v18 }
 0x1b5   : > { %1810 = vst.msk [vmem:[#allocation3] sm:$0x1] %vm209_vm0, %v1809_v10 }
 0x1bc   : > { %v2105_v21 = vld [vmem:[#allocation3] ss:$0 sm:$0xff] }
 0x1bd   : > { %v1824_v22 = vsel %vm1823_vm9, %v1815_v20, %v2105_v21 }
 0x1be   : > { %2142 = vmatmul.mubr.msk.f32.vlgmr.msra.gmra.mrb[0].mxu0 %vm1833_vm10, %v1824_v22 }
 0x291   : > { %v1903_v24 = vpop.f32.mrb[0].mxu0 }
 0x292   : > { %v1907_v59 = vmax.f32 %v1903_v24, 0.0  ;;  %v2143_v25 = vpop.f32.mrb[1].mxu0 }
 0x294   : > { %2147 = vmatmul.mubr.msk.f32.vlgmr.msra.gmra.mrb[0].mxu1 %vm1909_vm12, %v1907_v59 }
 0x367   : > { %v1983_v26 = vpop.f32.mrb[0].mxu1 }
 0x368   : > { %v1988_v15 = vrot.slane %v1983_v26, 1  ;;  %v2148_v27 = vpop.f32.mrb[1].mxu1 }
 0x36a   : > { %v1990_v30 = vadd.f32 %v1988_v15, %v1983_v26 }
 0x36c   : > { %v2109_v45 = vmul.f32 -1.442695, %v1990_v30 }
 0x36e   : > { %2241 = vpow2.f32 %v2109_v45 }
 0x378   : > { %v2242_v47 = vpop.eup %2241 }
 0x379   : > { %v1994_v31 = vadd.f32 1.0, %v2242_v47 }
 0x37b   : > { %2243 = vrcp.f32 %v1994_v31 }
 0x385   : > { %v2244_v32 = vpop.eup %2243 }
 0x386   : > { %1997 = vst.msk [vmem:[%s203_s9] sm:$0x1] %vm209_vm0, %v2244_v32 }
 0x387   : > { %2288 = shalt.err (!%p2285_p5)
}
 0x388   : > { %s2289_s11 = scalar_lea.hbm %s2916_s28, 16  ;;  %s2293_s19 = scalar_lea.hbm %s2969_s3, 32 }
 0x389   : > { %p2290_p4 = scmp.ne.s32.totalorder %s2916_s28, %s2289_s11  ;;  %p2294_p12 = scmp.lt.u32.totalorder %s2916_s28, %s2969_s3 }
 0x38a   : > { %p2295_p1 = scmp.lt.u32.totalorder %s2293_s19, %s2289_s11  ;;  %p2297_p8 = scmp.lt.u32.totalorder %s2289_s11, %s2916_s28 }
 0x38b   : > { %p2291_p7 = pnand %p2290_p4, %p2977_p9 }
 0x38c   : > { %p2296_p3 = por %p2295_p1, %p2294_p12 }
 0x38d   : > { %p2292_p10 = pneg %p2291_p7 }
 0x38e   : > { %p2298_p11 = por %p2297_p8, %p2296_p3 }
 0x390   : > { %p2299_p0 = pnand %p2298_p11, %p2292_p10 }
 0x392   : > { %2302 = shalt.err (!%p2299_p0)
}
 0x393   : > { %2163 = dma.vmem_to_hbm [thread:$0]  (%p2977_p9), %s2918_s10, 16, %s2916_s28, %s1999_s29  }
 0x394 PF: > { %s2023_s6 = sand.u32 1, %s2337_s12   ;;  %p2978_p6 = scmp.ne.s32.totalorder %s2974_s27, 0 }
 0x395   : > { %p2979_p13 = scmp.ge.s32.totalorder %s2357_s17, 2  ;;  %s2024_s8 = scalar_lea.sflag [#allocation6], %s2023_s6 }
 0x397   : > { %p2170_p2 = pnand %p2979_p13, %p2978_p6 }
 0x399   : > { %2332 = dma.done.wait (!%p2170_p2), %s2024_s8, 16  }
 0x39a   : > { %2334 = vsyncadd (!%p2170_p2), %s2024_s8, 4294967280  ;;  %s19_s17 = sadd.s32 1, %s2357_s17   ;;  %s2980_s12 = smov %s2341_s13 }
 0x39b   : > { %p16_p5 = scmp.ge.s32.totalorder %s19_s17, 4   ;;  %s2981_s13 = smov %s2345_s14 }
 0x39c   : > { %s2982_s14 = smov %s2445_s26  ;;  %s2983_s15 = smov %s2353_s16 }
 0x39d   : > { %s2984_s16 = smov %s2986_s20  ;;  %18 = sbr.rel (!%p16_p5) target bundleno = 6 (0x6), region = 85 }
 0x3a4   :  { %2028 = vsyncpa [#allocation5], 1 }
 0x3a5   :  { %2030 = vsyncpa [#allocation5 + $0x1], 1 }
 0x3a6   :  { %2031 = vsyncpa [#allocation6], 1 }
 0x3a7   :  { %2033 = vsyncpa [#allocation6 + $0x1], 1 }

</bundles_post_ra>
